<compile_context>
chip_gen: v7x
topology: tpu7x:2x2x1
jax: 0.10.0
libtpu: 0.0.40
codegen_flags: <defaults>
</compile_context>

<pallas_src>
import math

import jax
import jax.numpy as jnp
from jax.experimental import pallas as pl
from jax.experimental.pallas import tpu as pltpu


# ------------------------------ fused kernel -------------------------------

def _custom_gru_kernel(x_ref, h0_ref, *refs):
    """Whole CustomGRU forward for one batch tile, entirely in VMEM.

    refs = [w_cat_l, b_cat_l] * L, fc_out_w, fc_out_b, out_ref, hnew_ref

    Per layer, w_cat is the block-packed (I_l + H, 4H) weight:
        cols [0, 2H)  : [w_ih[:, :2H] ; w_hh[:, :2H]]   -> gi_rz + gh_rz
        cols [2H, 3H) : [w_ih[:, 2H:] ; 0]              -> gi_n
        cols [3H, 4H) : [0            ; w_hh[:, 2H:]]   -> gh_n
    b_cat = [b_ih_rz + b_hh_rz, b_ih_n, b_hh_n]         (1, 4H)
    (layer 0's w_ih/b_ih already have fc_in folded in).
    """
    L, _, H = h0_ref.shape
    layer_refs = refs[:2 * L]
    fcout_w, fcout_b, out_ref, hnew_ref = refs[2 * L:]

    inp = x_ref[...]
    new_h = []
    for l in range(L):
        w_cat = layer_refs[2 * l]
        b_cat = layer_refs[2 * l + 1]
        h_prev = h0_ref[l]                                       # (Bt, H)
        xh = jnp.concatenate([inp, h_prev], axis=-1)             # (Bt, I_l+H)
        g = jnp.dot(xh, w_cat[...],
                    preferred_element_type=jnp.float32) + b_cat[...]
        rz = jax.nn.sigmoid(g[:, :2 * H])                        # one EUP launch
        r, z = rz[:, :H], rz[:, H:]
        n = jnp.tanh(g[:, 2 * H:3 * H] + r * g[:, 3 * H:])
        h_new = n + z * (h_prev.astype(jnp.float32) - n)         # == (1-z)n + z*h
        new_h.append(h_new)
        inp = h_new.astype(x_ref.dtype)                          # next layer input

    hnew_ref[...] = jnp.stack(new_h)                             # single store
    out_ref[...] = (jnp.dot(inp, fcout_w[...],
                            preferred_element_type=jnp.float32)
                    + fcout_b[...]).astype(out_ref.dtype)


# ------------------------------ param packing ------------------------------

def pack_params(params, *, compute_dtype=jnp.float32):
    """Fold fc_in into layer 0 and block-pack each layer's weights/biases."""
    hp = jax.lax.Precision.HIGHEST
    H = params["gru_layers"][0]["w_hh"].shape[0]

    layers = []
    for l, lw in enumerate(params["gru_layers"]):
        w_ih, b_ih = lw["w_ih"], lw["b_ih"]
        if l == 0:
            # fc_in feeds layer-0's gi with no nonlinearity in between, so the
            # fold is exact up to rounding (done once, in f32 HIGHEST).
            b_ih = jnp.dot(params["fc_in_b"], w_ih, precision=hp) + b_ih
            w_ih = jnp.dot(params["fc_in_w"], w_ih, precision=hp)
        w_hh, b_hh = lw["w_hh"], lw["b_hh"]
        in_dim = w_ih.shape[0]

        w_cat = jnp.zeros((in_dim + H, 4 * H), jnp.float32)
        w_cat = w_cat.at[:in_dim, :2 * H].set(w_ih[:, :2 * H])
        w_cat = w_cat.at[in_dim:, :2 * H].set(w_hh[:, :2 * H])
        w_cat = w_cat.at[:in_dim, 2 * H:3 * H].set(w_ih[:, 2 * H:])
        w_cat = w_cat.at[in_dim:, 3 * H:].set(w_hh[:, 2 * H:])
        b_cat = jnp.concatenate(
            [b_ih[:2 * H] + b_hh[:2 * H], b_ih[2 * H:], b_hh[2 * H:]]
        ).reshape(1, 4 * H)
        # Biases stay f32 even when matmul operands are bf16.
        layers.append((w_cat.astype(compute_dtype), b_cat.astype(jnp.float32)))

    return dict(
        layers=layers,
        fc_out_w=params["fc_out_w"].astype(compute_dtype),
        fc_out_b=params["fc_out_b"].reshape(1, -1).astype(jnp.float32),
        hidden_size=H,
        num_layers=len(layers),
        compute_dtype=compute_dtype,
    )


# ------------------------------ wrapper ------------------------------------

def custom_gru_forward(packed, x, h0, *, batch_tile=None):
    """x: [B, Din] f32, h0: [L, B, H] f32 -> (out [B, Dout] f32, h_new [L, B, H] f32)."""
    B, Din = x.shape
    L, B2, H = h0.shape
    assert B2 == B and L == packed["num_layers"] and H == packed["hidden_size"]
    Dout = packed["fc_out_w"].shape[1]
    cdt = packed["compute_dtype"]

    # Grid sizing: the grid is a sequential loop on single-TC chips with
    # ~0.35us fixed cost per step, so keep a single step for small batches;
    # only tile the batch once per-block work amortizes the overhead (and to
    # shard across v7x's two TensorCores / fill the MXU's 128-256 rows).
    if batch_tile is None:
        if B <= 256:
            batch_tile = B
        else:
            batch_tile = next((t for t in (512, 256, 128) if B % t == 0), B)
    assert B % batch_tile == 0
    assert batch_tile == B or batch_tile % 8 == 0, "batch tile must be 8-aligned"
    grid = (B // batch_tile,)

    const = lambda i: (0, 0)
    layer_args, layer_specs = [], []
    for w_cat, b_cat in packed["layers"]:
        layer_args += [w_cat, b_cat]
        layer_specs += [pl.BlockSpec(w_cat.shape, const),
                        pl.BlockSpec(b_cat.shape, const)]
    # TODO(synk): when grid > 1 at production H/L, add pipeline_mode=
    #             pl.Buffered(1) to these constant-index weight specs to drop
    #             the second pipeline buffer (matters for v7x's 64 MiB VMEM).

    in_specs = ([pl.BlockSpec((batch_tile, Din), lambda i: (i, 0)),
                 pl.BlockSpec((L, batch_tile, H), lambda i: (0, i, 0))]
                + layer_specs
                + [pl.BlockSpec((H, Dout), const),
                   pl.BlockSpec((1, Dout), const)])

    out_shape = (jax.ShapeDtypeStruct((B, Dout), jnp.float32),
                 jax.ShapeDtypeStruct((L, B, H), jnp.float32))
    out_specs = (pl.BlockSpec((batch_tile, Dout), lambda i: (i, 0)),
                 pl.BlockSpec((L, batch_tile, H), lambda i: (0, i, 0)))

    return pl.pallas_call(
        _custom_gru_kernel,
        out_shape=out_shape,
        grid=grid,
        in_specs=in_specs,
        out_specs=out_specs,
        compiler_params=pltpu.CompilerParams(
            dimension_semantics=("parallel",),
            vmem_limit_bytes=32 * 1024 * 1024),
    )(x.astype(cdt), h0.astype(cdt),
      *layer_args,
      packed["fc_out_w"], packed["fc_out_b"])


# --------------------------- params & reference ----------------------------

def init_params(key, *, block_input_dim, block_output_dim, input_size,
                hidden_size, num_layers):
    keys = iter(jax.random.split(key, 8 + 4 * num_layers))

    def uniform(shape, bound):
        return jax.random.uniform(next(keys), shape, jnp.float32, -bound, bound)

    def linear(fan_in, fan_out):
        bound = 1.0 / math.sqrt(fan_in)
        return uniform((fan_in, fan_out), bound), uniform((fan_out,), bound)

    params = {}
    params["fc_in_w"], params["fc_in_b"] = linear(block_input_dim, input_size)
    params["fc_out_w"], params["fc_out_b"] = linear(hidden_size, block_output_dim)

    bound = 1.0 / math.sqrt(hidden_size)
    layers = []
    for l in range(num_layers):
        in_l = input_size if l == 0 else hidden_size
        layers.append(dict(
            # stored transposed vs. PyTorch ([in, 3H]), gate order (r, z, n)
            w_ih=uniform((in_l, 3 * hidden_size), bound),
            w_hh=uniform((hidden_size, 3 * hidden_size), bound),
            b_ih=uniform((3 * hidden_size,), bound),
            b_hh=uniform((3 * hidden_size,), bound),
        ))
    params["gru_layers"] = layers
    return params


def reference_forward(params, x, h0):
    """Pure-JAX reference of the same forward (unfused, f32, for correctness)."""
    hp = jax.lax.Precision.HIGHEST
    inp = jnp.dot(x, params["fc_in_w"], precision=hp) + params["fc_in_b"]
    H = h0.shape[-1]
    new_h = []
    for l, lw in enumerate(params["gru_layers"]):
        h_prev = h0[l]
        gi = jnp.dot(inp, lw["w_ih"], precision=hp) + lw["b_ih"]
        gh = jnp.dot(h_prev, lw["w_hh"], precision=hp) + lw["b_hh"]
        r = jax.nn.sigmoid(gi[:, 0:H] + gh[:, 0:H])
        z = jax.nn.sigmoid(gi[:, H:2 * H] + gh[:, H:2 * H])
        n = jnp.tanh(gi[:, 2 * H:] + r * gh[:, 2 * H:])
        hn = (1.0 - z) * n + z * h_prev
        new_h.append(hn)
        inp = hn
    out = jnp.dot(inp, params["fc_out_w"], precision=hp) + params["fc_out_b"]
    return out, jnp.stack(new_h)


# ----------------------------------- main -----------------------------------

if __name__ == "__main__":
    block_input_dim = 16
    block_output_dim = 16
    input_size = 32
    hidden_size = 32
    num_layers = 2
    B = 16

    root = jax.random.PRNGKey(0)
    k_param, k_x = jax.random.split(root)

    params = init_params(
        k_param,
        block_input_dim=block_input_dim,
        block_output_dim=block_output_dim,
        input_size=input_size,
        hidden_size=hidden_size,
        num_layers=num_layers,
    )

    x = jax.random.normal(k_x, (B, block_input_dim), jnp.float32)
    # First CustomGRU call: hidden_state is zeros(num_layers, 1, H) broadcast
    # over the batch, i.e. zeros(num_layers, B, H).
    h0 = jnp.zeros((num_layers, B, hidden_size), jnp.float32)

    ref_out, ref_h = reference_forward(params, x, h0)

    # --- f32 path (exact parity with the PyTorch/JAX reference) ---
    packed_f32 = pack_params(params, compute_dtype=jnp.float32)
    fwd = jax.jit(lambda xx, hh: custom_gru_forward(packed_f32, xx, hh))
    out, h_new = fwd(x, h0)
    jax.block_until_ready((out, h_new))

    assert out.shape == (B, block_output_dim), out.shape
    assert h_new.shape == (num_layers, B, hidden_size), h_new.shape
    assert bool(jnp.all(jnp.isfinite(out)))
    assert bool(jnp.allclose(out, ref_out, atol=2e-3, rtol=2e-3)), \
        float(jnp.max(jnp.abs(out - ref_out)))
    assert bool(jnp.allclose(h_new, ref_h, atol=2e-3, rtol=2e-3)), \
        float(jnp.max(jnp.abs(h_new - ref_h)))

    # --- bf16-operand path (2x MXU rate on v6e/v7x, halved weight bytes;
    #     accumulation and gate math stay f32) ---
    packed_bf16 = pack_params(params, compute_dtype=jnp.bfloat16)
    fwd_bf16 = jax.jit(lambda xx, hh: custom_gru_forward(packed_bf16, xx, hh))
    out_b, h_b = fwd_bf16(x, h0)
    jax.block_until_ready((out_b, h_b))
    assert bool(jnp.all(jnp.isfinite(out_b)))
    assert bool(jnp.allclose(out_b, ref_out, atol=5e-2, rtol=5e-2)), \
        float(jnp.max(jnp.abs(out_b - ref_out)))
    assert bool(jnp.allclose(h_b, ref_h, atol=5e-2, rtol=5e-2)), \
        float(jnp.max(jnp.abs(h_b - ref_h)))

    print("KERNEL_OK")
</pallas_src>

<mosaic_0001>
module attributes {stable_mosaic.version = 11 : i64} {
  func.func @_custom_gru_kernel(%arg0: i32, %arg1: memref<16x16xf32, #tpu.memory_space<vmem>>, %arg2: memref<2x16x32xf32, #tpu.memory_space<vmem>>, %arg3: memref<48x128xf32, #tpu.memory_space<vmem>>, %arg4: memref<1x128xf32, #tpu.memory_space<vmem>>, %arg5: memref<64x128xf32, #tpu.memory_space<vmem>>, %arg6: memref<1x128xf32, #tpu.memory_space<vmem>>, %arg7: memref<32x16xf32, #tpu.memory_space<vmem>>, %arg8: memref<1x16xf32, #tpu.memory_space<vmem>>, %arg9: memref<16x16xf32, #tpu.memory_space<vmem>>, %arg10: memref<2x16x32xf32, #tpu.memory_space<vmem>>) attributes {dimension_semantics = [#tpu.dimension_semantics<parallel>], iteration_bounds = array<i64: 1>, scalar_prefetch = 0 : i64, scratch_operands = 0 : i64, tpu.core_type = #tpu.core_type<tc>, window_params = [{transform_indices = @transform_0, window_bounds = array<i64: 16, 16>}, {transform_indices = @transform_1, window_bounds = array<i64: 2, 16, 32>}, {pipeline_mode = #tpu.pipeline_mode<synchronous>, transform_indices = @transform_2, window_bounds = array<i64: 48, 128>}, {pipeline_mode = #tpu.pipeline_mode<synchronous>, transform_indices = @transform_3, window_bounds = array<i64: 1, 128>}, {pipeline_mode = #tpu.pipeline_mode<synchronous>, transform_indices = @transform_4, window_bounds = array<i64: 64, 128>}, {pipeline_mode = #tpu.pipeline_mode<synchronous>, transform_indices = @transform_5, window_bounds = array<i64: 1, 128>}, {pipeline_mode = #tpu.pipeline_mode<synchronous>, transform_indices = @transform_6, window_bounds = array<i64: 32, 16>}, {pipeline_mode = #tpu.pipeline_mode<synchronous>, transform_indices = @transform_7, window_bounds = array<i64: 1, 16>}, {transform_indices = @transform_8, window_bounds = array<i64: 16, 16>}, {transform_indices = @transform_9, window_bounds = array<i64: 2, 16, 32>}]} {
    %c0 = arith.constant 0 : index
    %c0_0 = arith.constant 0 : index
    %0 = vector.load %arg1[%c0, %c0_0] : memref<16x16xf32, #tpu.memory_space<vmem>>, vector<16x16xf32>
    %c0_1 = arith.constant 0 : index
    %c0_2 = arith.constant 0 : index
    %c0_3 = arith.constant 0 : index
    %1 = vector.load %arg2[%c0_1, %c0_2, %c0_3] : memref<2x16x32xf32, #tpu.memory_space<vmem>>, vector<1x16x32xf32>
    %2 = vector.shape_cast %1 : vector<1x16x32xf32> to vector<16x32xf32>
    %3 = tpu.concatenate %0, %2 in 1 : vector<16x16xf32>, vector<16x32xf32> -> vector<16x48xf32>
    %c0_4 = arith.constant 0 : index
    %c0_5 = arith.constant 0 : index
    %4 = vector.load %arg3[%c0_4, %c0_5] : memref<48x128xf32, #tpu.memory_space<vmem>>, vector<48x128xf32>
    %cst = arith.constant dense<0.000000e+00> : vector<16x128xf32>
    %5 = tpu.matmul %3, %4, %cst {dimension_numbers = #tpu.dot_dimension_numbers<[1], [0], [0], [1], [0, 0, 1, 1], [], []>} : vector<16x48xf32>, vector<48x128xf32>, vector<16x128xf32> -> vector<16x128xf32>
    %c0_6 = arith.constant 0 : index
    %c0_7 = arith.constant 0 : index
    %6 = vector.load %arg4[%c0_6, %c0_7] : memref<1x128xf32, #tpu.memory_space<vmem>>, vector<1x128xf32>
    %7 = vector.broadcast %6 : vector<1x128xf32> to vector<16x128xf32>
    %8 = arith.addf %5, %7 : vector<16x128xf32>
    %9 = vector.extract_strided_slice %8 {offsets = [0, 0], sizes = [16, 64], strides = [1, 1]} : vector<16x128xf32> to vector<16x64xf32>
    %10 = arith.negf %9 : vector<16x64xf32>
    %11 = math.exp %10 : vector<16x64xf32>
    %cst_8 = arith.constant 1.000000e+00 : f32
    %12 = vector.broadcast %cst_8 : f32 to vector<16x64xf32>
    %13 = arith.addf %12, %11 : vector<16x64xf32>
    %14 = arith.divf %12, %13 : vector<16x64xf32>
    %15 = vector.extract_strided_slice %14 {offsets = [0, 0], sizes = [16, 32], strides = [1, 1]} : vector<16x64xf32> to vector<16x32xf32>
    %16 = vector.extract_strided_slice %14 {offsets = [0, 32], sizes = [16, 32], strides = [1, 1]} : vector<16x64xf32> to vector<16x32xf32>
    %17 = vector.extract_strided_slice %8 {offsets = [0, 64], sizes = [16, 32], strides = [1, 1]} : vector<16x128xf32> to vector<16x32xf32>
    %18 = vector.extract_strided_slice %8 {offsets = [0, 96], sizes = [16, 32], strides = [1, 1]} : vector<16x128xf32> to vector<16x32xf32>
    %19 = arith.mulf %15, %18 : vector<16x32xf32>
    %20 = arith.addf %17, %19 : vector<16x32xf32>
    %21 = math.tanh %20 : vector<16x32xf32>
    %22 = arith.subf %2, %21 : vector<16x32xf32>
    %23 = arith.mulf %16, %22 : vector<16x32xf32>
    %24 = arith.addf %21, %23 : vector<16x32xf32>
    %c1 = arith.constant 1 : index
    %c0_9 = arith.constant 0 : index
    %c0_10 = arith.constant 0 : index
    %25 = vector.load %arg2[%c1, %c0_9, %c0_10] : memref<2x16x32xf32, #tpu.memory_space<vmem>>, vector<1x16x32xf32>
    %26 = vector.shape_cast %25 : vector<1x16x32xf32> to vector<16x32xf32>
    %27 = tpu.concatenate %24, %26 in 1 : vector<16x32xf32>, vector<16x32xf32> -> vector<16x64xf32>
    %c0_11 = arith.constant 0 : index
    %c0_12 = arith.constant 0 : index
    %28 = vector.load %arg5[%c0_11, %c0_12] : memref<64x128xf32, #tpu.memory_space<vmem>>, vector<64x128xf32>
    %cst_13 = arith.constant dense<0.000000e+00> : vector<16x128xf32>
    %29 = tpu.matmul %27, %28, %cst_13 {dimension_numbers = #tpu.dot_dimension_numbers<[1], [0], [0], [1], [0, 0, 1, 1], [], []>} : vector<16x64xf32>, vector<64x128xf32>, vector<16x128xf32> -> vector<16x128xf32>
    %c0_14 = arith.constant 0 : index
    %c0_15 = arith.constant 0 : index
    %30 = vector.load %arg6[%c0_14, %c0_15] : memref<1x128xf32, #tpu.memory_space<vmem>>, vector<1x128xf32>
    %31 = vector.broadcast %30 : vector<1x128xf32> to vector<16x128xf32>
    %32 = arith.addf %29, %31 : vector<16x128xf32>
    %33 = vector.extract_strided_slice %32 {offsets = [0, 0], sizes = [16, 64], strides = [1, 1]} : vector<16x128xf32> to vector<16x64xf32>
    %34 = arith.negf %33 : vector<16x64xf32>
    %35 = math.exp %34 : vector<16x64xf32>
    %cst_16 = arith.constant 1.000000e+00 : f32
    %36 = vector.broadcast %cst_16 : f32 to vector<16x64xf32>
    %37 = arith.addf %36, %35 : vector<16x64xf32>
    %38 = arith.divf %36, %37 : vector<16x64xf32>
    %39 = vector.extract_strided_slice %38 {offsets = [0, 0], sizes = [16, 32], strides = [1, 1]} : vector<16x64xf32> to vector<16x32xf32>
    %40 = vector.extract_strided_slice %38 {offsets = [0, 32], sizes = [16, 32], strides = [1, 1]} : vector<16x64xf32> to vector<16x32xf32>
    %41 = vector.extract_strided_slice %32 {offsets = [0, 64], sizes = [16, 32], strides = [1, 1]} : vector<16x128xf32> to vector<16x32xf32>
    %42 = vector.extract_strided_slice %32 {offsets = [0, 96], sizes = [16, 32], strides = [1, 1]} : vector<16x128xf32> to vector<16x32xf32>
    %43 = arith.mulf %39, %42 : vector<16x32xf32>
    %44 = arith.addf %41, %43 : vector<16x32xf32>
    %45 = math.tanh %44 : vector<16x32xf32>
    %46 = arith.subf %26, %45 : vector<16x32xf32>
    %47 = arith.mulf %40, %46 : vector<16x32xf32>
    %48 = arith.addf %45, %47 : vector<16x32xf32>
    %49 = vector.shape_cast %24 : vector<16x32xf32> to vector<1x16x32xf32>
    %50 = vector.shape_cast %48 : vector<16x32xf32> to vector<1x16x32xf32>
    %51 = tpu.concatenate %49, %50 in 0 : vector<1x16x32xf32>, vector<1x16x32xf32> -> vector<2x16x32xf32>
    %c0_17 = arith.constant 0 : index
    %c0_18 = arith.constant 0 : index
    %c0_19 = arith.constant 0 : index
    %52 = vector.load %arg10[%c0_17, %c0_18, %c0_19] : memref<2x16x32xf32, #tpu.memory_space<vmem>>, vector<2x16x32xf32>
    tpu.vector_store %arg10[%c0_17, %c0_18, %c0_19], %51 {strides = array<i32>} : memref<2x16x32xf32, #tpu.memory_space<vmem>>, vector<2x16x32xf32>,
    %c0_20 = arith.constant 0 : index
    %c0_21 = arith.constant 0 : index
    %53 = vector.load %arg7[%c0_20, %c0_21] : memref<32x16xf32, #tpu.memory_space<vmem>>, vector<32x16xf32>
    %cst_22 = arith.constant dense<0.000000e+00> : vector<16x16xf32>
    %54 = tpu.matmul %48, %53, %cst_22 {dimension_numbers = #tpu.dot_dimension_numbers<[1], [0], [0], [1], [0, 0, 1, 1], [], []>} : vector<16x32xf32>, vector<32x16xf32>, vector<16x16xf32> -> vector<16x16xf32>
    %c0_23 = arith.constant 0 : index
    %c0_24 = arith.constant 0 : index
    %55 = vector.load %arg8[%c0_23, %c0_24] : memref<1x16xf32, #tpu.memory_space<vmem>>, vector<1x16xf32>
    %56 = vector.broadcast %55 : vector<1x16xf32> to vector<16x16xf32>
    %57 = arith.addf %54, %56 : vector<16x16xf32>
    %c0_25 = arith.constant 0 : index
    %c0_26 = arith.constant 0 : index
    %58 = vector.load %arg9[%c0_25, %c0_26] : memref<16x16xf32, #tpu.memory_space<vmem>>, vector<16x16xf32>
    tpu.vector_store %arg9[%c0_25, %c0_26], %57 {strides = array<i32>} : memref<16x16xf32, #tpu.memory_space<vmem>>, vector<16x16xf32>,
    return
  }
  func.func @transform_0(%arg0: i32) -> (i32, i32) {
    %c0_i32 = arith.constant 0 : i32
    %c0_i32_0 = arith.constant 0 : i32
    return %arg0, %c0_i32 : i32, i32
  }
  func.func @transform_1(%arg0: i32) -> (i32, i32, i32) {
    %c0_i32 = arith.constant 0 : i32
    %c0_i32_0 = arith.constant 0 : i32
    %c0_i32_1 = arith.constant 0 : i32
    return %c0_i32, %arg0, %c0_i32_0 : i32, i32, i32
  }
  func.func @transform_2(%arg0: i32) -> (i32, i32) {
    %c0_i32 = arith.constant 0 : i32
    %c0_i32_0 = arith.constant 0 : i32
    %c0_i32_1 = arith.constant 0 : i32
    return %c0_i32, %c0_i32_0 : i32, i32
  }
  func.func @transform_3(%arg0: i32) -> (i32, i32) {
    %c0_i32 = arith.constant 0 : i32
    %c0_i32_0 = arith.constant 0 : i32
    %c0_i32_1 = arith.constant 0 : i32
    return %c0_i32, %c0_i32_0 : i32, i32
  }
  func.func @transform_4(%arg0: i32) -> (i32, i32) {
    %c0_i32 = arith.constant 0 : i32
    %c0_i32_0 = arith.constant 0 : i32
    %c0_i32_1 = arith.constant 0 : i32
    return %c0_i32, %c0_i32_0 : i32, i32
  }
  func.func @transform_5(%arg0: i32) -> (i32, i32) {
    %c0_i32 = arith.constant 0 : i32
    %c0_i32_0 = arith.constant 0 : i32
    %c0_i32_1 = arith.constant 0 : i32
    return %c0_i32, %c0_i32_0 : i32, i32
  }
  func.func @transform_6(%arg0: i32) -> (i32, i32) {
    %c0_i32 = arith.constant 0 : i32
    %c0_i32_0 = arith.constant 0 : i32
    %c0_i32_1 = arith.constant 0 : i32
    return %c0_i32, %c0_i32_0 : i32, i32
  }
  func.func @transform_7(%arg0: i32) -> (i32, i32) {
    %c0_i32 = arith.constant 0 : i32
    %c0_i32_0 = arith.constant 0 : i32
    %c0_i32_1 = arith.constant 0 : i32
    return %c0_i32, %c0_i32_0 : i32, i32
  }
  func.func @transform_8(%arg0: i32) -> (i32, i32) {
    %c0_i32 = arith.constant 0 : i32
    %c0_i32_0 = arith.constant 0 : i32
    return %arg0, %c0_i32 : i32, i32
  }
  func.func @transform_9(%arg0: i32) -> (i32, i32, i32) {
    %c0_i32 = arith.constant 0 : i32
    %c0_i32_0 = arith.constant 0 : i32
    %c0_i32_1 = arith.constant 0 : i32
    return %c0_i32, %arg0, %c0_i32_0 : i32, i32, i32
  }
}

</mosaic_0001>

<bundles_post_ra>
// kernel: _lambda_.1
= control target key start
LH: loop header
LB: loop body
LE: loop exit
PB: predicated region body
PF: predicated region fallthrough
CT: control target
= control target key end

     0   :  { %15 = vsyncpa [#allocation3], 0  ;;  %s1159_s0 = inlined_call_operand.hbm [shape: f32[16,16], index: 0, kind: input, shape index: {}]   ;;  %s1160_s1 = inlined_call_operand.hbm [shape: f32[2,16,32], index: 1, kind: input, shape index: {}]   ;;  %s1161_s2 = inlined_call_operand.hbm [shape: f32[48,128], index: 2, kind: input, shape index: {}]   ;;  %s1162_s3 = inlined_call_operand.vmem [shape: f32[1,128], index: 3, kind: input, shape index: {}]   ;;  %s1163_s4 = inlined_call_operand.hbm [shape: f32[64,128], index: 4, kind: input, shape index: {}]   ;;  %s1164_s5 = inlined_call_operand.vmem [shape: f32[1,128], index: 5, kind: input, shape index: {}]   ;;  %s1165_s6 = inlined_call_operand.hbm [shape: f32[32,16], index: 6, kind: input, shape index: {}]   ;;  %s1166_s7 = inlined_call_operand.vmem [shape: f32[1,16], index: 7, kind: input, shape index: {}]   ;;  %s1167_s8 = inlined_call_operand.hbm [shape: f32[16,16], index: 8, kind: output, shape index: {0}]   ;;  %s1168_s9 = inlined_call_operand.hbm [shape: f32[2,16,32], index: 9, kind: output, shape index: {1}]  }
   0x1   :  { %16 = vsyncpa [#allocation6], 0 }
   0x2   :  { %17 = vsyncpa [#allocation9], 0 }
   0x3   :  { %18 = vsyncpa [#allocation4], 0 }
   0x4   :  { %19 = vsyncpa [#allocation13], 0  ;;  %s915_s30 = smov [#allocation5]   ;;  %s916_s11 = smov [#allocation8]  }
   0x5   :  { %s37_s10 = sshll.u32 %s915_s30, 4  ;;  %s63_s12 = sshll.u32 %s916_s11, 4  ;;  %s38_s10 = int_to_ptr.vmem [resolvable:$true] %s37_s10  ;;  %s977_s12 = int_to_ptr.vmem [resolvable:$true] %s63_s12 }
   0x6   :  { %s751_s15 = scalar_lea.hbm %s1160_s1, 512 }
   0x7   :  { %p752_p0 = scmp.ne.s32.totalorder %s1160_s1, %s751_s15  ;;  %p755_p1 = scmp.lt.u32.totalorder %s751_s15, %s1160_s1 }
   0x9   :  { %p757_p2 = pnand %p755_p1, %p752_p0 }
   0xb   :  { %760 = shalt.err (!%p757_p2)
}
   0xc   :  { %s761_s20 = scalar_lea.vmem %s38_s10, 512  ;;  %p766_p4 = scmp.lt.s32.totalorder %s38_s10, %s38_s10 }
   0xd   :  { %p762_p3 = scmp.ne.s32.totalorder %s38_s10, %s761_s20  ;;  %p767_p5 = scmp.lt.s32.totalorder %s761_s20, %s761_s20 }
   0xf   :  { %p768_p6 = por %p767_p5, %p766_p4 }
  0x11   :  { %p769_p7 = pnand %p768_p6, %p762_p3 }
  0x13   :  { %772 = shalt.err (!%p769_p7)
}
  0x14   :  { %s917_s21 = smov 128   ;;  %s918_s22 = smov 8  }
  0x15   :  { %43 = dma.hbm_to_vmem [thread:$0]  %s1160_s1, 512, %s38_s10, [#allocation6], %s917_s21, %s917_s21, %s918_s22  }
  0x16   :  { %s773_s27 = scalar_lea.hbm %s1163_s4, 1024 }
  0x17   :  { %p774_p8 = scmp.ne.s32.totalorder %s1163_s4, %s773_s27  ;;  %p777_p9 = scmp.lt.u32.totalorder %s773_s27, %s1163_s4 }
  0x19   :  { %p779_p10 = pnand %p777_p9, %p774_p8 }
  0x1b   :  { %782 = shalt.err (!%p779_p10)
}
  0x1c   :  { %s783_s13 = scalar_lea.vmem %s977_s12, 1024  ;;  %p788_p12 = scmp.lt.s32.totalorder %s977_s12, %s977_s12 }
  0x1d   :  { %p784_p11 = scmp.ne.s32.totalorder %s977_s12, %s783_s13  ;;  %p789_p13 = scmp.lt.s32.totalorder %s783_s13, %s783_s13 }
  0x1f   :  { %p790_p0 = por %p789_p13, %p788_p12 }
  0x21   :  { %p791_p1 = pnand %p790_p0, %p784_p11 }
  0x23   :  { %794 = shalt.err (!%p791_p1)
}
  0x24   :  { %69 = dma.hbm_to_vmem [thread:$0]  %s1163_s4, 1024, %s977_s12, [#allocation9], %s917_s21, %s917_s21, %s918_s22  }
  0x25   :  { %s919_s14 = smov [#allocation2]   ;;  %s920_s16 = smov [#allocation7]  }
  0x26   :  { %s25_s15 = sshll.u32 %s919_s14, 4  ;;  %s49_s17 = sshll.u32 %s920_s16, 4  ;;  %s26_s15 = int_to_ptr.vmem [resolvable:$true] %s25_s15  ;;  %s1014_s17 = int_to_ptr.vmem [resolvable:$true] %s49_s17 }
  0x27   :  { %s795_s20 = scalar_lea.hbm %s1159_s0, 256 }
  0x28   :  { %p796_p2 = scmp.ne.s32.totalorder %s1159_s0, %s795_s20  ;;  %p799_p3 = scmp.lt.u32.totalorder %s795_s20, %s1159_s0 }
  0x2a   :  { %p801_p4 = pnand %p799_p3, %p796_p2 }
  0x2c   :  { %804 = shalt.err (!%p801_p4)
}
  0x2d   :  { %s805_s4 = scalar_lea.vmem %s26_s15, 256  ;;  %p810_p6 = scmp.lt.s32.totalorder %s26_s15, %s26_s15 }
  0x2e   :  { %p806_p5 = scmp.ne.s32.totalorder %s26_s15, %s805_s4  ;;  %p811_p7 = scmp.lt.s32.totalorder %s805_s4, %s805_s4 }
  0x30   :  { %p812_p8 = por %p811_p7, %p810_p6 }
  0x32   :  { %p813_p9 = pnand %p812_p8, %p806_p5 }
  0x34   :  { %816 = shalt.err (!%p813_p9)
}
  0x35   :  { %31 = dma.hbm_to_vmem [thread:$0]  %s1159_s0, 256, %s26_s15, [#allocation3], %s917_s21, %s917_s21, %s918_s22  }
  0x36   :  { %s817_s30 = scalar_lea.hbm %s1161_s2, 768 }
  0x37   :  { %p818_p10 = scmp.ne.s32.totalorder %s1161_s2, %s817_s30  ;;  %p821_p11 = scmp.lt.u32.totalorder %s817_s30, %s1161_s2 }
  0x39   :  { %p823_p12 = pnand %p821_p11, %p818_p10 }
  0x3b   :  { %826 = shalt.err (!%p823_p12)
}
  0x3c   :  { %s827_s14 = scalar_lea.vmem %s1014_s17, 768  ;;  %p832_p0 = scmp.lt.s32.totalorder %s1014_s17, %s1014_s17 }
  0x3d   :  { %p828_p13 = scmp.ne.s32.totalorder %s1014_s17, %s827_s14  ;;  %p833_p1 = scmp.lt.s32.totalorder %s827_s14, %s827_s14 }
  0x3f   :  { %p834_p2 = por %p833_p1, %p832_p0 }
  0x41   :  { %p835_p3 = pnand %p834_p2, %p828_p13 }
  0x43   :  { %838 = shalt.err (!%p835_p3)
}
  0x44   :  { %55 = dma.hbm_to_vmem [thread:$0]  %s1161_s2, 768, %s1014_s17, [#allocation6], %s917_s21, %s917_s21, %s918_s22  }
  0x45   :  { %s921_s16 = smov [#allocation10]   ;;  %s839_s23 = scalar_lea.hbm %s1165_s6, 512 }
  0x46   :  { %s77_s18 = sshll.u32 %s921_s16, 4  ;;  %p840_p4 = scmp.ne.s32.totalorder %s1165_s6, %s839_s23  ;;  %s78_s18 = int_to_ptr.vmem [resolvable:$true] %s77_s18 }
  0x47   :  { %p843_p5 = scmp.lt.u32.totalorder %s839_s23, %s1165_s6 }
  0x49   :  { %p845_p6 = pnand %p843_p5, %p840_p4 }
  0x4b   :  { %848 = shalt.err (!%p845_p6)
}
  0x4c   :  { %s849_s12 = scalar_lea.vmem %s78_s18, 512  ;;  %p854_p8 = scmp.lt.s32.totalorder %s78_s18, %s78_s18 }
  0x4d   :  { %p850_p7 = scmp.ne.s32.totalorder %s78_s18, %s849_s12  ;;  %p855_p9 = scmp.lt.s32.totalorder %s849_s12, %s849_s12 }
  0x4f   :  { %p856_p10 = por %p855_p9, %p854_p8 }
  0x51   :  { %p857_p11 = pnand %p856_p10, %p850_p7 }
  0x53   :  { %860 = shalt.err (!%p857_p11)
}
  0x54   :  { %83 = dma.hbm_to_vmem [thread:$0]  %s1165_s6, 512, %s78_s18, [#allocation9], %s917_s21, %s917_s21, %s918_s22  }
  0x55   :  { %905 = dma.done.wait [#allocation3], 256  }
  0x56   :  { %906 = vsyncadd [#allocation3], 4294967040 }
  0x57   :  { %907 = dma.done.wait [#allocation6], 1280  }
  0x58   :  { %908 = vsyncadd [#allocation6], 4294966016 }
  0x59   :  { %909 = dma.done.wait [#allocation9], 1536  }
  0x5a   :  { %910 = vsyncadd [#allocation9], 4294965760  ;;  %v1066_v0 = vld [vmem:[#allocation5] sm:$0xff]  ;;  %s922_s27 = smov 16   ;;  %v117_v2 = vld [vmem:[#allocation7 + $0x8] sm:$0xff]  ;;  %vm113_vm0 = vcmask 130048  }
  0x5b   :  { %v116_v1 = vld [vmem:[#allocation7] sm:$0xff]  ;;  %107 = vrot.lane.b32.xlu0 %v1066_v0, %s922_s27  ;;  %v118_v3 = vld [vmem:[#allocation7 + $0x10] sm:$0xff]  ;;  %v119_v4 = vld [vmem:[#allocation7 + $0x18] sm:$0xff]  ;;  %vm129_vm1 = vcmask 392192   ;;  %s923_s29 = smov 32   ;;  %vm294_vm2 = vcmask 261120  }
  0x5c   :  { %v1069_v5 = vld [vmem:[#allocation5 + $0x8] sm:$0xff]  ;;  %v679_v6 = vpack.c.bf16 %v117_v2, %v116_v1  ;;  %v683_v7 = vpack.c.bf16 %v119_v4, %v118_v3  ;;  %v120_v8 = vld [vmem:[#allocation7 + $0x20] sm:$0xff]  ;;  %v101_v11 = vld [vmem:[#allocation2] sm:$0xff]  ;;  %vm312_vm3 = vcmask 523264  }
  0x5d   :  { %v121_v9 = vld [vmem:[#allocation7 + $0x28] sm:$0xff]  ;;  %v102_v14 = vld [vmem:[#allocation2 + $0x8] sm:$0xff]  ;;  %v597_v17 = vld [vmem:[%s1162_s3] ss:$0 sm:$0xff]  ;;  %s924_s3 = smov 64  }
  0x5e   :  { %680 = vmatprep.subr.bf16.mxu0 %v679_v6  ;;  %v687_v10 = vpack.c.bf16 %v121_v9, %v120_v8  ;;  %v297_v44 = vld [vmem:[#allocation8] sm:$0xff]  ;;  %v298_v45 = vld [vmem:[#allocation8 + $0x8] sm:$0xff]  ;;  %v299_v46 = vld [vmem:[#allocation8 + $0x10] sm:$0xff] }
  0x5f   :  { %109 = vrot.lane.b32.xlu0 %v1069_v5, %s922_s27  ;;  %682 = vmatpush3.bf16.msra.mxu0 %v679_v6  ;;  %v691_v47 = vpack.c.bf16 %v298_v45, %v297_v44  ;;  %v300_v48 = vld [vmem:[#allocation8 + $0x18] sm:$0xff]  ;;  %v301_v50 = vld [vmem:[#allocation8 + $0x20] sm:$0xff]  ;;  %v302_v51 = vld [vmem:[#allocation8 + $0x28] sm:$0xff] }
  0x60   :  { %684 = vmatprep.subr.bf16.mxu0 %v683_v7  ;;  %v695_v49 = vpack.c.bf16 %v300_v48, %v299_v46  ;;  %v699_v54 = vpack.c.bf16 %v302_v51, %v301_v50  ;;  %v1089_v57 = vld [vmem:[#allocation5 + $0x10] sm:$0xff]  ;;  %v1093_v58 = vld [vmem:[#allocation5 + $0x18] sm:$0xff]  ;;  %v303_v59 = vld [vmem:[#allocation8 + $0x30] sm:$0xff] }
  0x61   :  { %692 = vmatprep.subr.bf16.mxu1 %v691_v47  ;;  %v304_v60 = vld [vmem:[#allocation8 + $0x38] sm:$0xff]  ;;  %v602_v8 = vld [vmem:[%s1164_s5] ss:$0 sm:$0xff]  ;;  %s925_s5 = smov [#allocation12]  }
  0x62   :  { %694 = vmatpush3.bf16.msra.mxu1 %v691_v47  ;;  %v703_v61 = vpack.c.bf16 %v304_v60, %v303_v59  ;;  %s579_s13 = sshll.u32 %s925_s5, 4  ;;  %s580_s13 = int_to_ptr.vmem [resolvable:$true] %s579_s13 }
  0x63   :  { %686 = vmatpush3.bf16.msra.mxu0 %v683_v7  ;;  %696 = vmatprep.subr.bf16.mxu1 %v695_v49  ;;  %s861_s1 = scalar_lea.vmem %s580_s13, 512  ;;  %p866_p13 = scmp.lt.s32.totalorder %s580_s13, %s580_s13 }
  0x64   :  { %688 = vmatprep.subr.bf16.mxu0 %v687_v10  ;;  %p862_p12 = scmp.ne.s32.totalorder %s580_s13, %s861_s1  ;;  %p867_p0 = scmp.lt.s32.totalorder %s861_s1, %s861_s1 }
  0x66   :  { %698 = vmatpush3.bf16.msra.mxu1 %v695_v49  ;;  %p868_p1 = por %p867_p0, %p866_p13 }
  0x67   :  { %690 = vmatpush3.bf16.msra.mxu0 %v687_v10  ;;  %700 = vmatprep.subr.bf16.mxu1 %v699_v54 }
  0x68   :  { %p869_p2 = pnand %p868_p1, %p862_p12 }
  0x6a   :  { %702 = vmatpush3.bf16.msra.mxu1 %v699_v54 }
  0x6b   :  { %704 = vmatprep.subr.bf16.mxu1 %v703_v61 }
  0x6e   :  { %706 = vmatpush3.bf16.msra.mxu1 %v703_v61 }
  0xcd   :  { %v108_v12 = vpop.permute.xlu0 %107 }
  0xce   :  { %v114_v13 = vsel %vm113_vm0, %v101_v11, %v108_v12 }
  0xcf   :  { %646 = vmatprep.mubr.msk.f32.mxu0 %vm129_vm1, %v114_v13 }
  0xd1   :  { %v110_v15 = vpop.permute.xlu0 %109 }
  0xd2   :  { %v115_v16 = vsel %vm113_vm0, %v102_v14, %v110_v15 }
  0xd3   :  { %647 = vmatmul.mubr.msk.f32.vlgmr.msra.gmra.mrb[0].mxu0 %vm129_vm1, %v115_v16 }
 0x1a6   :  { %v648_v18 = vpop.f32.mrb[0].mxu0 }
 0x1a7   :  { %v202_v19 = vpop.f32.mrb[1].mxu0  ;;  %v208_v21 = vadd.f32 %v648_v18, %v597_v17 }
 0x1a8   :  { %v203_v20 = vadd.f32 %v597_v17, %v202_v19 }
 0x1a9   :  { %v601_v23 = vmul.f32 -1.442695, %v208_v21 }
 0x1aa   :  { %225 = vrot.lane.b32.xlu1 %v203_v20, %s923_s29  ;;  %v600_v22 = vmul.f32 -1.442695, %v203_v20 }
 0x1ac   :  { %727 = vpow2.f32 %v600_v22 }
 0x1ad   :  { %729 = vpow2.f32 %v601_v23 }
 0x1ae   :  { %227 = vrot.lane.b32.xlu1 %v208_v21, %s923_s29 }
 0x1b6   :  { %v728_v24 = vpop.eup %727 }
 0x1b7   :  { %v217_v25 = vadd.f32 1.0, %v728_v24  ;;  %v730_v26 = vpop.eup %729 }
 0x1b8   :  { %v218_v27 = vadd.f32 1.0, %v730_v26 }
 0x1b9   :  { %731 = vrcp.f32 %v217_v25 }
 0x1ba   :  { %733 = vrcp.f32 %v218_v27 }
 0x1c3   :  { %v732_v28 = vpop.eup %731 }
 0x1c4   :  { %v734_v31 = vpop.eup %733 }
 0x21c   :  { %v226_v29 = vpop.permute.xlu1 %225 }
 0x21d   :  { %v231_v30 = vmul.f32 %v732_v28, %v226_v29 }
 0x21f   :  { %235 = vrot.lane.b32.xlu0 %v231_v30, %s924_s3 }
 0x220   :  { %v228_v32 = vpop.permute.xlu1 %227 }
 0x221   :  { %v232_v33 = vmul.f32 %v734_v31, %v228_v32 }
 0x223   :  { %237 = vrot.lane.b32.xlu1 %v232_v33, %s924_s3 }
 0x291   :  { %v236_v34 = vpop.permute.xlu0 %235 }
 0x292   :  { %v241_v35 = vadd.f32 %v236_v34, %v203_v20 }
 0x294   :  { %735 = vtanh.f32 %v241_v35  ;;  %v470_v35 = vld [vmem:[#allocation10] sm:$0xff] }
 0x295   :  { %v238_v36 = vpop.permute.xlu1 %237 }
 0x296   :  { %v242_v37 = vadd.f32 %v238_v36, %v208_v21  ;;  %v471_v36 = vld [vmem:[#allocation10 + $0x8] sm:$0xff] }
 0x298   :  { %737 = vtanh.f32 %v242_v37  ;;  %v472_v37 = vld [vmem:[#allocation10 + $0x10] sm:$0xff] }
 0x29e   :  { %v736_v38 = vpop.eup %735 }
 0x29f   :  { %247 = vrot.lane.b32.xlu0 %v736_v38, %s924_s3 }
 0x2a2   :  { %v738_v39 = vpop.eup %737 }
 0x2a3   :  { %249 = vrot.lane.b32.xlu1 %v738_v39, %s924_s3 }
 0x311   :  { %v248_v40 = vpop.permute.xlu0 %247 }
 0x312   :  { %v253_v41 = vsub.f32 %v1066_v0, %v248_v40 }
 0x314   :  { %257 = vrot.lane.b32.xlu0 %v253_v41, %s923_s29 }
 0x315   :  { %v250_v42 = vpop.permute.xlu1 %249 }
 0x316   :  { %v254_v43 = vsub.f32 %v1069_v5, %v250_v42 }
 0x318   :  { %259 = vrot.lane.b32.xlu1 %v254_v43, %s923_s29 }
 0x386   :  { %v258_v52 = vpop.permute.xlu0 %257 }
 0x387   :  { %v263_v53 = vmul.f32 %v732_v28, %v258_v52 }
 0x389   :  { %267 = vrot.lane.b32.xlu0 %v263_v53, %s923_s29 }
 0x38a   :  { %v260_v55 = vpop.permute.xlu1 %259 }
 0x38b   :  { %v264_v56 = vmul.f32 %v734_v31, %v260_v55 }
 0x38d   :  { %269 = vrot.lane.b32.xlu1 %v264_v56, %s923_s29 }
 0x391   :  { %288 = vrot.lane.b32.xlu1 %v1089_v57, %s923_s29 }
 0x395   :  { %290 = vrot.lane.b32.xlu1 %v1093_v58, %s923_s29 }
 0x3fb   :  { %v268_v62 = vpop.permute.xlu0 %267 }
 0x3fc   :  { %v273_v63 = vadd.f32 %v736_v38, %v268_v62  ;;  %v707_v38 = vpack.c.bf16 %v471_v36, %v470_v35 }
 0x3fe   :  { %280 = vrot.lane.b32.xlu0 %v273_v63, %s924_s3  ;;  %708 = vmatprep.subr.bf16.mxu0 %v707_v38 }
 0x3ff   :  { %v270_v0 = vpop.permute.xlu1 %269  ;;  %710 = vmatpush3.bf16.msra.mxu0 %v707_v38 }
 0x400   :  { %v274_v1 = vadd.f32 %v738_v39, %v270_v0  ;;  %v473_v39 = vld [vmem:[#allocation10 + $0x18] sm:$0xff] }
 0x401   :  { %v711_v40 = vpack.c.bf16 %v473_v39, %v472_v37 }
 0x402   :  { %282 = vrot.lane.b32.xlu0 %v274_v1, %s924_s3 }
 0x403   :  { %v289_v2 = vpop.permute.xlu1 %288  ;;  %712 = vmatprep.subr.bf16.mxu0 %v711_v40 }
 0x404   :  { %714 = vmatpush3.bf16.msra.mxu0 %v711_v40 }
 0x407   :  { %v291_v5 = vpop.permute.xlu1 %290 }
 0x470   :  { %v281_v3 = vpop.permute.xlu0 %280 }
 0x471   :  { %466 = vst.msk [vmem:[#allocation12] sm:$0xff] %vm294_vm2, %v281_v3  ;;  %v295_v4 = vsel %vm294_vm2, %v281_v3, %v289_v2 }
 0x472   :  { %665 = vmatprep.mubr.msk.f32.mxu1 %vm312_vm3, %v295_v4 }
 0x474   :  { %v283_v6 = vpop.permute.xlu0 %282 }
 0x475   :  { %v296_v7 = vsel %vm294_vm2, %v283_v6, %v291_v5  ;;  %467 = vst.msk [vmem:[#allocation12 + $0x8] sm:$0xff] %vm294_vm2, %v283_v6 }
 0x476   :  { %666 = vmatmul.mubr.msk.f32.vlgmr.msra.gmra.mrb[0].mxu1 %vm312_vm3, %v296_v7 }
 0x549   :  { %v667_v9 = vpop.f32.mrb[0].mxu1 }
 0x54a   :  { %v391_v10 = vadd.f32 %v667_v9, %v602_v8  ;;  %v385_v11 = vpop.f32.mrb[1].mxu1 }
 0x54b   :  { %v386_v12 = vadd.f32 %v602_v8, %v385_v11 }
 0x54c   :  { %410 = vrot.lane.b32.xlu1 %v391_v10, %s923_s29  ;;  %v606_v13 = vmul.f32 -1.442695, %v391_v10 }
 0x54d   :  { %408 = vrot.lane.b32.xlu0 %v386_v12, %s923_s29  ;;  %v605_v14 = vmul.f32 -1.442695, %v386_v12 }
 0x54e   :  { %739 = vpow2.f32 %v606_v13 }
 0x54f   :  { %741 = vpow2.f32 %v605_v14 }
 0x558   :  { %v740_v15 = vpop.eup %739 }
 0x559   :  { %v742_v16 = vpop.eup %741  ;;  %v401_v17 = vadd.f32 1.0, %v740_v15 }
 0x55a   :  { %v400_v18 = vadd.f32 1.0, %v742_v16 }
 0x55b   :  { %743 = vrcp.f32 %v401_v17 }
 0x55c   :  { %745 = vrcp.f32 %v400_v18 }
 0x565   :  { %v744_v19 = vpop.eup %743 }
 0x566   :  { %v746_v21 = vpop.eup %745 }
 0x5be   :  { %v411_v20 = vpop.permute.xlu1 %410 }
 0x5bf   :  { %v415_v22 = vmul.f32 %v744_v19, %v411_v20  ;;  %v409_v23 = vpop.permute.xlu0 %408 }
 0x5c0   :  { %v414_v24 = vmul.f32 %v746_v21, %v409_v23 }
 0x5c1   :  { %420 = vrot.lane.b32.xlu1 %v415_v22, %s924_s3 }
 0x5c2   :  { %418 = vrot.lane.b32.xlu0 %v414_v24, %s924_s3 }
 0x633   :  { %v421_v25 = vpop.permute.xlu1 %420 }
 0x634   :  { %v425_v26 = vadd.f32 %v421_v25, %v391_v10  ;;  %v419_v27 = vpop.permute.xlu0 %418 }
 0x635   :  { %v424_v28 = vadd.f32 %v419_v27, %v386_v12 }
 0x636   :  { %747 = vtanh.f32 %v425_v26 }
 0x637   :  { %749 = vtanh.f32 %v424_v28 }
 0x640   :  { %v748_v29 = vpop.eup %747 }
 0x641   :  { %v750_v30 = vpop.eup %749  ;;  %432 = vrot.lane.b32.xlu1 %v748_v29, %s924_s3 }
 0x642   :  { %430 = vrot.lane.b32.xlu0 %v750_v30, %s924_s3 }
 0x6b3   :  { %v433_v31 = vpop.permute.xlu1 %432 }
 0x6b4   :  { %v437_v32 = vsub.f32 %v1093_v58, %v433_v31  ;;  %v431_v33 = vpop.permute.xlu0 %430 }
 0x6b5   :  { %v436_v34 = vsub.f32 %v1089_v57, %v431_v33 }
 0x6b6   :  { %442 = vrot.lane.b32.xlu1 %v437_v32, %s923_s29 }
 0x6b7   :  { %440 = vrot.lane.b32.xlu0 %v436_v34, %s923_s29 }
 0x728   :  { %v443_v41 = vpop.permute.xlu1 %442 }
 0x729   :  { %v447_v42 = vmul.f32 %v744_v19, %v443_v41  ;;  %v441_v43 = vpop.permute.xlu0 %440 }
 0x72a   :  { %v446_v44 = vmul.f32 %v746_v21, %v441_v43 }
 0x72b   :  { %452 = vrot.lane.b32.xlu1 %v447_v42, %s923_s29 }
 0x72c   :  { %450 = vrot.lane.b32.xlu0 %v446_v44, %s923_s29 }
 0x79d   :  { %v453_v45 = vpop.permute.xlu1 %452 }
 0x79e   :  { %v457_v46 = vadd.f32 %v748_v29, %v453_v45  ;;  %v451_v47 = vpop.permute.xlu0 %450 }
 0x79f   :  { %v456_v48 = vadd.f32 %v750_v30, %v451_v47 }
 0x7a0   :  { %462 = vrot.lane.b32.xlu1 %v457_v46, %s924_s3 }
 0x7a1   :  { %460 = vrot.lane.b32.xlu0 %v456_v48, %s924_s3 }
 0x812   :  { %v463_v49 = vpop.permute.xlu1 %462 }
 0x813   :  { %469 = vst.msk [vmem:[#allocation12 + $0x18] sm:$0xff] %vm294_vm2, %v463_v49  ;;  %v461_v50 = vpop.permute.xlu0 %460 }
 0x814   :  { %468 = vst.msk [vmem:[#allocation12 + $0x10] sm:$0xff] %vm294_vm2, %v461_v50  ;;  %676 = vmatprep.mubr.msk.f32.mxu0 %vm294_vm2, %v461_v50 }
 0x815   :  { %677 = vmatmul.mubr.msk.f32.vlgmr.msra.gmra.mrb[2].mxu0 %vm294_vm2, %v463_v49 }
 0x816   :  { %872 = shalt.err (!%p869_p2)
}
 0x817   :  { %s873_s0 = scalar_lea.hbm %s1168_s9, 512 }
 0x818   :  { %p874_p3 = scmp.ne.s32.totalorder %s1168_s9, %s873_s0  ;;  %p877_p4 = scmp.lt.u32.totalorder %s873_s0, %s1168_s9 }
 0x81a   :  { %p879_p5 = pnand %p877_p4, %p874_p3 }
 0x81c   :  { %882 = shalt.err (!%p879_p5)
}
 0x81d   :  { %585 = dma.vmem_to_hbm [thread:$0]  %s580_s13, 512, %s1168_s9, [#allocation13], %s917_s21, %s917_s21, %s918_s22  }
 0x81e   :  { %v607_v51 = vld [vmem:[%s1166_s7] ss:$0 sm:$0xff]  ;;  %s926_s26 = smov [#allocation11]  }
 0x81f   :  { %s567_s4 = sshll.u32 %s926_s26, 4  ;;  %s568_s4 = int_to_ptr.vmem [resolvable:$true] %s567_s4 }
 0x820   :  { %s883_s12 = scalar_lea.vmem %s568_s4, 256  ;;  %p888_p7 = scmp.lt.s32.totalorder %s568_s4, %s568_s4 }
 0x821   :  { %p884_p6 = scmp.ne.s32.totalorder %s568_s4, %s883_s12  ;;  %p889_p8 = scmp.lt.s32.totalorder %s883_s12, %s883_s12 }
 0x823   :  { %p890_p9 = por %p889_p8, %p888_p7 }
 0x825   :  { %p891_p10 = pnand %p890_p9, %p884_p6 }
 0x8e8   :  { %v678_v52 = vpop.f32.mrb[2].mxu0 }
 0x8e9   :  { %v557_v53 = vadd.f32 %v678_v52, %v607_v51  ;;  %v551_v54 = vpop.f32.mrb[3].mxu0 }
 0x8ea   :  { %v552_v55 = vadd.f32 %v607_v51, %v551_v54 }
 0x8eb   :  { %561 = vst.msk [vmem:[#allocation11 + $0x8] sm:$0xff] %vm113_vm0, %v557_v53 }
 0x8ec   :  { %560 = vst.msk [vmem:[#allocation11] sm:$0xff] %vm113_vm0, %v552_v55 }
 0x8ed   :  { %894 = shalt.err (!%p891_p10)
}
 0x8ee   :  { %s895_s2 = scalar_lea.hbm %s1167_s8, 256 }
 0x8ef   :  { %p896_p11 = scmp.ne.s32.totalorder %s1167_s8, %s895_s2  ;;  %p899_p12 = scmp.lt.u32.totalorder %s895_s2, %s1167_s8 }
 0x8f1   :  { %p901_p13 = pnand %p899_p12, %p896_p11 }
 0x8f3   :  { %904 = shalt.err (!%p901_p13)
}
 0x8f4   :  { %573 = dma.vmem_to_hbm [thread:$0]  %s568_s4, 256, %s1167_s8, [#allocation4], %s917_s21, %s917_s21, %s918_s22  }
 0x8f5   :  { %911 = dma.done.wait [#allocation4], 256  }
 0x8f6   :  { %912 = vsyncadd [#allocation4], 4294967040 }
 0x8f7   :  { %913 = dma.done.wait [#allocation13], 512  }
 0x8f8   :  { %914 = vsyncadd [#allocation13], 4294966784 }
 0x8f9   :  { %592 = vsyncpa [#allocation3], 1 }
 0x8fa   :  { %593 = vsyncpa [#allocation6], 1 }
 0x8fb   :  { %594 = vsyncpa [#allocation9], 1 }
 0x8fc   :  { %595 = vsyncpa [#allocation4], 1 }
 0x8fd   :  { %596 = vsyncpa [#allocation13], 1 }

</bundles_post_ra>
